<compile_context>
chip_gen: v7x
topology: tpu7x:2x2x1
jax: 0.10.0
libtpu: 0.0.40
codegen_flags: <defaults>
</compile_context>

<pallas_src>
import jax
import jax.numpy as jnp
import numpy as np
from jax.experimental import pallas as pl
from jax.experimental.pallas import tpu as pltpu

LANE = 128                      # channel axis padded to a multiple of this
MATMUL_DTYPE = jnp.bfloat16     # MXU operand dtype (f32 accumulation)
ACT_DTYPE = jnp.bfloat16        # inter-layer activation storage in HBM
VMEM_LIMIT_BYTES = 32 * 1024 * 1024


def _round_up(n, m):
    return (n + m - 1) // m * m


def _itemsize(dt):
    return np.dtype(dt).itemsize


# ---------------------------------------------------------------------------
# In-kernel building blocks (all math in f32; MXU operands cast to bf16).
# ---------------------------------------------------------------------------
def _elu(z):
    return jnp.where(z > 0, z, jnp.exp(z) - 1.0)


def _shifted_taps(x3):
    """x3: (TB, L, Cp) f32.  Returns (x[l-1 mod L], x, x[l+1 mod L]) with the
    circular wrap applied *per batch element*, each flattened to (TB*L, Cp) so
    TB*L becomes the MXU M dimension.  Shifts use 2-D sublane rolls (XLU) on
    each (L, Cp) slice; re-assembly is an 8-aligned sublane concat (L % 8 == 0
    at the demo shapes -> no data movement)."""
    tb, L, cp = x3.shape
    xm_parts, xp_parts = [], []
    for t in range(tb):                       # static unroll; TB is bounded
        xt = x3[t]                            # (L, Cp) slice of the value
        xm_parts.append(pltpu.roll(xt, 1, axis=0))       # x[(l-1) % L]
        xp_parts.append(pltpu.roll(xt, L - 1, axis=0))   # x[(l+1) % L], shift >= 0
    xm = xm_parts[0] if tb == 1 else jnp.concatenate(xm_parts, axis=0)
    xp = xp_parts[0] if tb == 1 else jnp.concatenate(xp_parts, axis=0)
    return xm, x3.reshape(tb * L, cp), xp


def _maxpool3(z3):
    """MaxPool1d(kernel=3, stride=1, padding=1) along L with -inf padding.
    z3: (TB, L, Cp) f32 -> (TB, L, Cp) f32."""
    tb, L, cp = z3.shape
    zm, zc, zp = _shifted_taps(z3)            # circularly wrapped neighbours
    # Only the first/last row of each batch element is affected by the wrap;
    # a full-tile select keeps the lowering simple and is negligible next to
    # the fused conv matmul.
    l_idx = jax.lax.broadcasted_iota(jnp.int32, (tb, L, cp), 1).reshape(tb * L, cp)
    zm = jnp.where(l_idx == 0, -jnp.inf, zm)          # no left neighbour at l=0
    zp = jnp.where(l_idx == L - 1, -jnp.inf, zp)      # no right neighbour at l=L-1
    return jnp.maximum(jnp.maximum(zm, zc), zp).reshape(tb, L, cp)


def _conv3(xm, xc, xp, w_ref):
    """Circular k=3 conv as three accumulating MXU dots (no lane-axis concat).
    xm/xc/xp: (M, Cp) f32; w_ref: (3, Cp, Cp) MATMUL_DTYPE -> (M, Cp) f32."""
    dt = w_ref.dtype
    y = jnp.dot(xm.astype(dt), w_ref[0], preferred_element_type=jnp.float32)
    y = y + jnp.dot(xc.astype(dt), w_ref[1], preferred_element_type=jnp.float32)
    y = y + jnp.dot(xp.astype(dt), w_ref[2], preferred_element_type=jnp.float32)
    return y


def _accumulate_stats(y, ssum_ref, ssq_ref):
    """Per-channel sum / sum-of-squares accumulated across the 'arbitrary'
    grid axis (constant output block index per core -> VMEM-resident).
    NOTE: variance is folded wrapper-side as E[y^2]-mean^2 from f32 sums of
    the f32 MXU accumulator (not the bf16-stored y); fine at these scales,
    switch to a Welford/shifted accumulation if |mean| >> std ever matters."""
    @pl.when(pl.program_id(1) == 0)
    def _():
        ssum_ref[...] = jnp.zeros_like(ssum_ref)
        ssq_ref[...] = jnp.zeros_like(ssq_ref)
    ssum_ref[...] += jnp.sum(y, axis=0, keepdims=True)[None]
    ssq_ref[...] += jnp.sum(y * y, axis=0, keepdims=True)[None]


# ---------------------------------------------------------------------------
# Kernels.
# ---------------------------------------------------------------------------
def _conv_stats_kernel(x_ref, w_ref, y_ref, ssum_ref, ssq_ref):
    """First layer: circular conv (MXU) + BatchNorm batch statistics."""
    tb, L, cp = x_ref.shape
    x3 = x_ref[...].astype(jnp.float32)
    xm, xc, xp = _shifted_taps(x3)
    y = _conv3(xm, xc, xp, w_ref)                       # (TB*L, Cp) f32
    y_ref[...] = y.reshape(tb, L, cp).astype(y_ref.dtype)
    _accumulate_stats(y, ssum_ref, ssq_ref)


def _fused_bn_elu_pool_conv_kernel(y_ref, scale_ref, shift_ref, w_ref,
                                   o_ref, ssum_ref, ssq_ref):
    """Layer i epilogue fused with layer i+1 conv:
    folded-BN affine + ELU + MaxPool on the incoming block (still in VMEM),
    then immediately the next circular conv + its BN statistics."""
    tb, L, cp = y_ref.shape
    z = y_ref[...].astype(jnp.float32) * scale_ref[...] + shift_ref[...]
    a3 = _maxpool3(_elu(z))                             # layer-i output, f32
    am, ac, ap = _shifted_taps(a3)
    y = _conv3(am, ac, ap, w_ref)                       # layer i+1 conv
    o_ref[...] = y.reshape(tb, L, cp).astype(o_ref.dtype)
    _accumulate_stats(y, ssum_ref, ssq_ref)


def _bn_elu_pool_kernel(y_ref, scale_ref, shift_ref, o_ref):
    """Last layer epilogue: folded-BN affine + ELU + MaxPool."""
    z = y_ref[...].astype(jnp.float32) * scale_ref[...] + shift_ref[...]
    o_ref[...] = _maxpool3(_elu(z)).astype(o_ref.dtype)


# ---------------------------------------------------------------------------
# pallas_call wrappers.
# ---------------------------------------------------------------------------
def _pick_tb(B, L, Cp):
    """Largest divisor TB of B such that the fused kernel's estimated VMEM
    footprint fits the budget and TB*L (MXU M dim) stays <= ~1024 rows."""
    budget = 3 * VMEM_LIMIT_BYTES // 4
    tb = 1
    for cand in range(1, B + 1):
        if B % cand:
            continue
        rows = cand * L
        blk = rows * Cp
        est = (2 * 2 * blk * _itemsize(ACT_DTYPE)          # in/out act blocks, 2x buffered
               + 8 * blk * 4                               # f32 in-kernel temporaries
               + 2 * 3 * Cp * Cp * _itemsize(MATMUL_DTYPE))  # weights
        if rows <= 1024 and cand <= 64 and est <= budget:
            tb = cand
    return tb


def _weight_spec(Cp, index_map):
    w_bytes = 3 * Cp * Cp * _itemsize(MATMUL_DTYPE)
    if w_bytes >= (4 << 20):
        # Grid-invariant operand: single-buffer to reclaim VMEM (matters only
        # for large Cp, e.g. on v7x's 64 MiB VMEM).  Never triggered at demo Cp.
        return pl.BlockSpec((3, Cp, Cp), index_map, pipeline_mode=pl.Buffered(1))
    return pl.BlockSpec((3, Cp, Cp), index_map)


def _grid_and_specs(B, L, Cp, TB):
    nb = B // TB
    nc = 2 if nb % 2 == 0 else 1          # shard the MXU pass over v7x's 2 cores
    per_core = nb // nc
    act_spec = pl.BlockSpec((TB, L, Cp), lambda c, i: (c * per_core + i, 0, 0))
    chan_spec = pl.BlockSpec((1, Cp), lambda c, i: (0, 0))
    stat_spec = pl.BlockSpec((1, 1, Cp), lambda c, i: (c, 0, 0))
    w_spec = _weight_spec(Cp, lambda c, i: (0, 0, 0))
    return nc, per_core, act_spec, chan_spec, stat_spec, w_spec


def _conv_stats_call(x, w, TB):
    B, L, Cp = x.shape
    nc, per_core, act_spec, _, stat_spec, w_spec = _grid_and_specs(B, L, Cp, TB)
    return pl.pallas_call(
        _conv_stats_kernel,
        out_shape=(jax.ShapeDtypeStruct((B, L, Cp), ACT_DTYPE),
                   jax.ShapeDtypeStruct((nc, 1, Cp), jnp.float32),
                   jax.ShapeDtypeStruct((nc, 1, Cp), jnp.float32)),
        grid=(nc, per_core),
        in_specs=[act_spec, w_spec],
        out_specs=(act_spec, stat_spec, stat_spec),
        compiler_params=pltpu.CompilerParams(
            dimension_semantics=("parallel", "arbitrary"),
            vmem_limit_bytes=VMEM_LIMIT_BYTES),
    )(x, w)


def _fused_call(y, scale, shift, w, TB):
    B, L, Cp = y.shape
    nc, per_core, act_spec, chan_spec, stat_spec, w_spec = _grid_and_specs(B, L, Cp, TB)
    return pl.pallas_call(
        _fused_bn_elu_pool_conv_kernel,
        out_shape=(jax.ShapeDtypeStruct((B, L, Cp), ACT_DTYPE),
                   jax.ShapeDtypeStruct((nc, 1, Cp), jnp.float32),
                   jax.ShapeDtypeStruct((nc, 1, Cp), jnp.float32)),
        grid=(nc, per_core),
        in_specs=[act_spec, chan_spec, chan_spec, w_spec],
        out_specs=(act_spec, stat_spec, stat_spec),
        input_output_aliases={0: 0},      # write the next y into the old y buffer
        compiler_params=pltpu.CompilerParams(
            dimension_semantics=("parallel", "arbitrary"),
            vmem_limit_bytes=VMEM_LIMIT_BYTES),
    )(y, scale, shift, w)


def _bn_elu_pool_call(y, scale, shift, TB):
    B, L, Cp = y.shape
    nb = B // TB
    act_spec = pl.BlockSpec((TB, L, Cp), lambda i: (i, 0, 0))
    chan_spec = pl.BlockSpec((1, Cp), lambda i: (0, 0))
    return pl.pallas_call(
        _bn_elu_pool_kernel,
        out_shape=jax.ShapeDtypeStruct((B, L, Cp), ACT_DTYPE),
        grid=(nb,),
        in_specs=[act_spec, chan_spec, chan_spec],
        out_specs=act_spec,
        input_output_aliases={0: 0},
        compiler_params=pltpu.CompilerParams(
            dimension_semantics=("parallel",),
            vmem_limit_bytes=VMEM_LIMIT_BYTES),
    )(y, scale, shift)


def _fold_bn(ssum, ssq, gamma, beta, count):
    """Fold training-mode BatchNorm (biased batch stats, eps=1e-5) into a
    per-channel scale/shift from the per-core partial sums.  Tiny (C,) math."""
    s = jnp.sum(ssum, axis=0)[0]
    sq = jnp.sum(ssq, axis=0)[0]
    mean = s / count
    var = jnp.maximum(sq / count - mean * mean, 0.0)
    inv_std = jax.lax.rsqrt(var + 1e-5)
    scale = gamma * inv_std
    shift = beta - mean * scale
    return scale.reshape(1, -1), shift.reshape(1, -1)


@jax.jit
def conv_layer_forward(x, params):
    """ConvLayer.forward.  x: (B, L, C); params: list of (w3, b, gamma, beta)
    with w3 stored as (3, C_in, C_out) (= transpose of PyTorch (C_out, C_in, 3))."""
    B, L, C = x.shape
    Cp = _round_up(C, LANE)
    n_layers = len(params)

    # Pad channels once; padded channels stay exactly 0 through every layer.
    xpad = jnp.pad(x.astype(ACT_DTYPE), ((0, 0), (0, 0), (0, Cp - C)))

    ws, gammas, betas = [], [], []
    for (w3, b, gamma, beta) in params:
        del b   # conv bias cancels exactly under training-mode BatchNorm
        w_p = jnp.zeros((3, Cp, Cp), jnp.float32).at[:, :C, :C].set(w3)
        ws.append(w_p.astype(MATMUL_DTYPE))
        gammas.append(jnp.ones((Cp,), jnp.float32).at[:C].set(gamma))
        betas.append(jnp.zeros((Cp,), jnp.float32).at[:C].set(beta))

    TB = _pick_tb(B, L, Cp)
    count = jnp.float32(B * L)

    # Layer 1 conv + stats, then fused (epilogue_i + conv_{i+1}) calls, then
    # the standalone epilogue of the last layer.
    y, ssum, ssq = _conv_stats_call(xpad, ws[0], TB)
    for i in range(1, n_layers):
        scale, shift = _fold_bn(ssum, ssq, gammas[i - 1], betas[i - 1], count)
        y, ssum, ssq = _fused_call(y, scale, shift, ws[i], TB)
    scale, shift = _fold_bn(ssum, ssq, gammas[-1], betas[-1], count)
    out = _bn_elu_pool_call(y, scale, shift, TB)
    return out[:, :, :C].astype(x.dtype)


# ---------------------------------------------------------------------------
# Pure-JAX reference mirroring the PyTorch module (NCL layout inside).
# ---------------------------------------------------------------------------
def reference_forward(x, params):
    y = jnp.transpose(x, (0, 2, 1))                               # (B, C, L)
    for (w3, b, gamma, beta) in params:
        wt = jnp.transpose(w3, (2, 1, 0))                         # (C_out, C_in, 3)
        L = y.shape[-1]
        ypad = jnp.concatenate([y[..., -1:], y, y[..., :1]], axis=-1)
        conv = sum(jnp.einsum('bcl,oc->bol', ypad[..., k:k + L], wt[:, :, k])
                   for k in range(3)) + b[None, :, None]
        mean = conv.mean(axis=(0, 2), keepdims=True)
        var = ((conv - mean) ** 2).mean(axis=(0, 2), keepdims=True)
        bn = (conv - mean) / jnp.sqrt(var + 1e-5)
        bn = bn * gamma[None, :, None] + beta[None, :, None]
        act = jnp.where(bn > 0, bn, jnp.exp(bn) - 1.0)
        pad = jnp.full_like(act[..., :1], -jnp.inf)
        apad = jnp.concatenate([pad, act, pad], axis=-1)
        y = jnp.maximum(jnp.maximum(apad[..., :-2], apad[..., 1:-1]),
                        apad[..., 2:])
    return jnp.transpose(y, (0, 2, 1))


def init_params(key, c_in, n_layers):
    """Deterministic parameters.  Conv follows PyTorch's kaiming-uniform bound;
    BN gamma/beta are randomised (instead of the 1/0 defaults) purely to
    exercise the folded affine path in the test."""
    params = []
    bound = 1.0 / np.sqrt(c_in * 3)
    for _ in range(n_layers):
        key, kw, kb, kg, kbe = jax.random.split(key, 5)
        w = jax.random.uniform(kw, (3, c_in, c_in), jnp.float32, -bound, bound)
        b = jax.random.uniform(kb, (c_in,), jnp.float32, -bound, bound)
        gamma = jax.random.uniform(kg, (c_in,), jnp.float32, 0.5, 1.5)
        beta = jax.random.uniform(kbe, (c_in,), jnp.float32, -0.5, 0.5)
        params.append((w, b, gamma, beta))
    return params


if __name__ == "__main__":
    B, L, C = 2, 16, 8
    n_layers = 2

    key = jax.random.PRNGKey(0)
    key, kx = jax.random.split(key)
    x = jax.random.normal(kx, (B, L, C), jnp.float32)
    params = init_params(key, C, n_layers)

    out = jax.block_until_ready(conv_layer_forward(x, params))
    ref = jax.block_until_ready(reference_forward(x, params))

    # Tolerance accounts for bf16 MXU operands / bf16 inter-layer activations
    # (per the performance review); with f32 dtypes 1e-4 would hold.
    bf16_used = (MATMUL_DTYPE == jnp.bfloat16) or (ACT_DTYPE == jnp.bfloat16)
    tol = 5e-2 if bf16_used else 1e-4
    np.testing.assert_allclose(np.asarray(out), np.asarray(ref),
                               atol=tol, rtol=tol)
    assert out.shape == (B, L, C)
    print("KERNEL_OK")
</pallas_src>

<mosaic_0001>
module attributes {stable_mosaic.version = 11 : i64} {
  func.func @_conv_stats_kernel(%arg0: i32, %arg1: i32, %arg2: memref<2x16x128xbf16, #tpu.memory_space<vmem>>, %arg3: memref<3x128x128xbf16, #tpu.memory_space<vmem>>, %arg4: memref<2x16x128xbf16, #tpu.memory_space<vmem>>, %arg5: memref<1x1x128xf32, #tpu.memory_space<vmem>>, %arg6: memref<1x1x128xf32, #tpu.memory_space<vmem>>) attributes {dimension_semantics = [#tpu.dimension_semantics<parallel>, #tpu.dimension_semantics<arbitrary>], iteration_bounds = array<i64: 1, 1>, scalar_prefetch = 0 : i64, scratch_operands = 0 : i64, tpu.core_type = #tpu.core_type<tc>, window_params = [{transform_indices = @transform_0, window_bounds = array<i64: 2, 16, 128>}, {pipeline_mode = #tpu.pipeline_mode<synchronous>, transform_indices = @transform_1, window_bounds = array<i64: 3, 128, 128>}, {transform_indices = @transform_2, window_bounds = array<i64: 2, 16, 128>}, {transform_indices = @transform_3, window_bounds = array<i64: 1, 1, 128>}, {transform_indices = @transform_4, window_bounds = array<i64: 1, 1, 128>}]} {
    %c0 = arith.constant 0 : index
    %c0_0 = arith.constant 0 : index
    %c0_1 = arith.constant 0 : index
    %0 = vector.load %arg2[%c0, %c0_0, %c0_1] : memref<2x16x128xbf16, #tpu.memory_space<vmem>>, vector<2x16x128xbf16>
    %1 = arith.extf %0 : vector<2x16x128xbf16> to vector<2x16x128xf32>
    %2 = vector.extract_strided_slice %1 {offsets = [0, 0, 0], sizes = [1, 16, 128], strides = [1, 1, 1]} : vector<2x16x128xf32> to vector<1x16x128xf32>
    %3 = vector.shape_cast %2 : vector<1x16x128xf32> to vector<16x128xf32>
    %c1_i32 = arith.constant 1 : i32
    %4 = tpu.dynamic_rotate %3 by %c1_i32 dim 0 : vector<16x128xf32>, i32 -> vector<16x128xf32>
    %c15_i32 = arith.constant 15 : i32
    %5 = tpu.dynamic_rotate %3 by %c15_i32 dim 0 : vector<16x128xf32>, i32 -> vector<16x128xf32>
    %6 = vector.extract_strided_slice %1 {offsets = [1, 0, 0], sizes = [1, 16, 128], strides = [1, 1, 1]} : vector<2x16x128xf32> to vector<1x16x128xf32>
    %7 = vector.shape_cast %6 : vector<1x16x128xf32> to vector<16x128xf32>
    %c1_i32_2 = arith.constant 1 : i32
    %8 = tpu.dynamic_rotate %7 by %c1_i32_2 dim 0 : vector<16x128xf32>, i32 -> vector<16x128xf32>
    %c15_i32_3 = arith.constant 15 : i32
    %9 = tpu.dynamic_rotate %7 by %c15_i32_3 dim 0 : vector<16x128xf32>, i32 -> vector<16x128xf32>
    %10 = tpu.concatenate %4, %8 in 0 : vector<16x128xf32>, vector<16x128xf32> -> vector<32x128xf32>
    %11 = tpu.concatenate %5, %9 in 0 : vector<16x128xf32>, vector<16x128xf32> -> vector<32x128xf32>
    %12 = vector.shape_cast %1 : vector<2x16x128xf32> to vector<32x128xf32>
    %13 = arith.truncf %10 : vector<32x128xf32> to vector<32x128xbf16>
    %c0_4 = arith.constant 0 : index
    %c0_5 = arith.constant 0 : index
    %c0_6 = arith.constant 0 : index
    %14 = vector.load %arg3[%c0_4, %c0_5, %c0_6] : memref<3x128x128xbf16, #tpu.memory_space<vmem>>, vector<1x128x128xbf16>
    %15 = vector.shape_cast %14 : vector<1x128x128xbf16> to vector<128x128xbf16>
    %cst = arith.constant dense<0.000000e+00> : vector<32x128xf32>
    %16 = tpu.matmul %13, %15, %cst {dimension_numbers = #tpu.dot_dimension_numbers<[1], [0], [0], [1], [0, 0, 1, 1], [], []>} : vector<32x128xbf16>, vector<128x128xbf16>, vector<32x128xf32> -> vector<32x128xf32>
    %17 = arith.truncf %12 : vector<32x128xf32> to vector<32x128xbf16>
    %c1 = arith.constant 1 : index
    %c0_7 = arith.constant 0 : index
    %c0_8 = arith.constant 0 : index
    %18 = vector.load %arg3[%c1, %c0_7, %c0_8] : memref<3x128x128xbf16, #tpu.memory_space<vmem>>, vector<1x128x128xbf16>
    %19 = vector.shape_cast %18 : vector<1x128x128xbf16> to vector<128x128xbf16>
    %cst_9 = arith.constant dense<0.000000e+00> : vector<32x128xf32>
    %20 = tpu.matmul %17, %19, %cst_9 {dimension_numbers = #tpu.dot_dimension_numbers<[1], [0], [0], [1], [0, 0, 1, 1], [], []>} : vector<32x128xbf16>, vector<128x128xbf16>, vector<32x128xf32> -> vector<32x128xf32>
    %21 = arith.addf %16, %20 : vector<32x128xf32>
    %22 = arith.truncf %11 : vector<32x128xf32> to vector<32x128xbf16>
    %c2 = arith.constant 2 : index
    %c0_10 = arith.constant 0 : index
    %c0_11 = arith.constant 0 : index
    %23 = vector.load %arg3[%c2, %c0_10, %c0_11] : memref<3x128x128xbf16, #tpu.memory_space<vmem>>, vector<1x128x128xbf16>
    %24 = vector.shape_cast %23 : vector<1x128x128xbf16> to vector<128x128xbf16>
    %cst_12 = arith.constant dense<0.000000e+00> : vector<32x128xf32>
    %25 = tpu.matmul %22, %24, %cst_12 {dimension_numbers = #tpu.dot_dimension_numbers<[1], [0], [0], [1], [0, 0, 1, 1], [], []>} : vector<32x128xbf16>, vector<128x128xbf16>, vector<32x128xf32> -> vector<32x128xf32>
    %26 = arith.addf %21, %25 : vector<32x128xf32>
    %27 = vector.shape_cast %26 : vector<32x128xf32> to vector<2x16x128xf32>
    %28 = arith.truncf %27 : vector<2x16x128xf32> to vector<2x16x128xbf16>
    %c0_13 = arith.constant 0 : index
    %c0_14 = arith.constant 0 : index
    %c0_15 = arith.constant 0 : index
    %29 = vector.load %arg4[%c0_13, %c0_14, %c0_15] : memref<2x16x128xbf16, #tpu.memory_space<vmem>>, vector<2x16x128xbf16>
    tpu.vector_store %arg4[%c0_13, %c0_14, %c0_15], %28 {strides = array<i32>} : memref<2x16x128xbf16, #tpu.memory_space<vmem>>, vector<2x16x128xbf16>,
    %c0_i32 = arith.constant 0 : i32
    %30 = arith.cmpi eq, %arg1, %c0_i32 : i32
    %31 = arith.extui %30 : i1 to i32
    %c0_i32_16 = arith.constant 0 : i32
    %32 = arith.cmpi ne, %31, %c0_i32_16 : i32
    scf.if %32 {
      %cst_31 = arith.constant 0.000000e+00 : f32
      %46 = vector.broadcast %cst_31 : f32 to vector<1x1x128xf32>
      %c0_32 = arith.constant 0 : index
      %c0_33 = arith.constant 0 : index
      %c0_34 = arith.constant 0 : index
      %47 = vector.load %arg5[%c0_32, %c0_33, %c0_34] : memref<1x1x128xf32, #tpu.memory_space<vmem>>, vector<1x1x128xf32>
      tpu.vector_store %arg5[%c0_32, %c0_33, %c0_34], %46 {strides = array<i32>} : memref<1x1x128xf32, #tpu.memory_space<vmem>>, vector<1x1x128xf32>,
      %cst_35 = arith.constant 0.000000e+00 : f32
      %48 = vector.broadcast %cst_35 : f32 to vector<1x1x128xf32>
      %c0_36 = arith.constant 0 : index
      %c0_37 = arith.constant 0 : index
      %c0_38 = arith.constant 0 : index
      %49 = vector.load %arg6[%c0_36, %c0_37, %c0_38] : memref<1x1x128xf32, #tpu.memory_space<vmem>>, vector<1x1x128xf32>
      tpu.vector_store %arg6[%c0_36, %c0_37, %c0_38], %48 {strides = array<i32>} : memref<1x1x128xf32, #tpu.memory_space<vmem>>, vector<1x1x128xf32>,
    } else {
    }
    %c0_17 = arith.constant 0 : index
    %c0_18 = arith.constant 0 : index
    %c0_19 = arith.constant 0 : index
    %33 = vector.load %arg5[%c0_17, %c0_18, %c0_19] : memref<1x1x128xf32, #tpu.memory_space<vmem>>, vector<1x1x128xf32>
    %cst_20 = arith.constant dense<0.000000e+00> : vector<128xf32>
    %34 = vector.multi_reduction <add>, %26, %cst_20 [0] : vector<32x128xf32> to vector<128xf32>
    %35 = vector.shape_cast %34 : vector<128xf32> to vector<1x128xf32>
    %36 = vector.shape_cast %35 : vector<1x128xf32> to vector<1x1x128xf32>
    %37 = arith.addf %33, %36 : vector<1x1x128xf32>
    %c0_21 = arith.constant 0 : index
    %c0_22 = arith.constant 0 : index
    %c0_23 = arith.constant 0 : index
    %38 = vector.load %arg5[%c0_21, %c0_22, %c0_23] : memref<1x1x128xf32, #tpu.memory_space<vmem>>, vector<1x1x128xf32>
    tpu.vector_store %arg5[%c0_21, %c0_22, %c0_23], %37 {strides = array<i32>} : memref<1x1x128xf32, #tpu.memory_space<vmem>>, vector<1x1x128xf32>,
    %c0_24 = arith.constant 0 : index
    %c0_25 = arith.constant 0 : index
    %c0_26 = arith.constant 0 : index
    %39 = vector.load %arg6[%c0_24, %c0_25, %c0_26] : memref<1x1x128xf32, #tpu.memory_space<vmem>>, vector<1x1x128xf32>
    %40 = arith.mulf %26, %26 : vector<32x128xf32>
    %cst_27 = arith.constant dense<0.000000e+00> : vector<128xf32>
    %41 = vector.multi_reduction <add>, %40, %cst_27 [0] : vector<32x128xf32> to vector<128xf32>
    %42 = vector.shape_cast %41 : vector<128xf32> to vector<1x128xf32>
    %43 = vector.shape_cast %42 : vector<1x128xf32> to vector<1x1x128xf32>
    %44 = arith.addf %39, %43 : vector<1x1x128xf32>
    %c0_28 = arith.constant 0 : index
    %c0_29 = arith.constant 0 : index
    %c0_30 = arith.constant 0 : index
    %45 = vector.load %arg6[%c0_28, %c0_29, %c0_30] : memref<1x1x128xf32, #tpu.memory_space<vmem>>, vector<1x1x128xf32>
    tpu.vector_store %arg6[%c0_28, %c0_29, %c0_30], %44 {strides = array<i32>} : memref<1x1x128xf32, #tpu.memory_space<vmem>>, vector<1x1x128xf32>,
    return
  }
  func.func @transform_0(%arg0: i32, %arg1: i32) -> (i32, i32, i32) {
    %c1_i32 = arith.constant 1 : i32
    %0 = arith.muli %arg0, %c1_i32 : i32
    %1 = arith.addi %0, %arg1 : i32
    %c0_i32 = arith.constant 0 : i32
    %c0_i32_0 = arith.constant 0 : i32
    %c0_i32_1 = arith.constant 0 : i32
    return %1, %c0_i32, %c0_i32_0 : i32, i32, i32
  }
  func.func @transform_1(%arg0: i32, %arg1: i32) -> (i32, i32, i32) {
    %c0_i32 = arith.constant 0 : i32
    %c0_i32_0 = arith.constant 0 : i32
    %c0_i32_1 = arith.constant 0 : i32
    %c0_i32_2 = arith.constant 0 : i32
    return %c0_i32, %c0_i32_0, %c0_i32_1 : i32, i32, i32
  }
  func.func @transform_2(%arg0: i32, %arg1: i32) -> (i32, i32, i32) {
    %c1_i32 = arith.constant 1 : i32
    %0 = arith.muli %arg0, %c1_i32 : i32
    %1 = arith.addi %0, %arg1 : i32
    %c0_i32 = arith.constant 0 : i32
    %c0_i32_0 = arith.constant 0 : i32
    %c0_i32_1 = arith.constant 0 : i32
    return %1, %c0_i32, %c0_i32_0 : i32, i32, i32
  }
  func.func @transform_3(%arg0: i32, %arg1: i32) -> (i32, i32, i32) {
    %c0_i32 = arith.constant 0 : i32
    %c0_i32_0 = arith.constant 0 : i32
    %c0_i32_1 = arith.constant 0 : i32
    return %arg0, %c0_i32, %c0_i32_0 : i32, i32, i32
  }
  func.func @transform_4(%arg0: i32, %arg1: i32) -> (i32, i32, i32) {
    %c0_i32 = arith.constant 0 : i32
    %c0_i32_0 = arith.constant 0 : i32
    %c0_i32_1 = arith.constant 0 : i32
    return %arg0, %c0_i32, %c0_i32_0 : i32, i32, i32
  }
}

module attributes {stable_mosaic.version = 11 : i64} {
  func.func @_bn_elu_pool_kernel(%arg0: i32, %arg1: memref<2x16x128xbf16, #tpu.memory_space<vmem>>, %arg2: memref<1x128xf32, #tpu.memory_space<vmem>>, %arg3: memref<1x128xf32, #tpu.memory_space<vmem>>, %arg4: memref<2x16x128xbf16, #tpu.memory_space<vmem>>) attributes {dimension_semantics = [#tpu.dimension_semantics<parallel>], iteration_bounds = array<i64: 1>, scalar_prefetch = 0 : i64, scratch_operands = 0 : i64, tpu.core_type = #tpu.core_type<tc>, window_params = [{transform_indices = @transform_0, window_bounds = array<i64: 2, 16, 128>}, {pipeline_mode = #tpu.pipeline_mode<synchronous>, transform_indices = @transform_1, window_bounds = array<i64: 1, 128>}, {pipeline_mode = #tpu.pipeline_mode<synchronous>, transform_indices = @transform_2, window_bounds = array<i64: 1, 128>}, {transform_indices = @transform_3, window_bounds = array<i64: 2, 16, 128>}]} {
    %c0 = arith.constant 0 : index
    %c0_0 = arith.constant 0 : index
    %c0_1 = arith.constant 0 : index
    %0 = vector.load %arg1[%c0, %c0_0, %c0_1] : memref<2x16x128xbf16, #tpu.memory_space<vmem>>, vector<2x16x128xbf16>
    %1 = arith.extf %0 : vector<2x16x128xbf16> to vector<2x16x128xf32>
    %c0_2 = arith.constant 0 : index
    %c0_3 = arith.constant 0 : index
    %2 = vector.load %arg2[%c0_2, %c0_3] : memref<1x128xf32, #tpu.memory_space<vmem>>, vector<1x128xf32>
    %3 = vector.shape_cast %2 : vector<1x128xf32> to vector<1x1x128xf32>
    %4 = vector.broadcast %3 : vector<1x1x128xf32> to vector<2x16x128xf32>
    %5 = arith.mulf %1, %4 : vector<2x16x128xf32>
    %c0_4 = arith.constant 0 : index
    %c0_5 = arith.constant 0 : index
    %6 = vector.load %arg3[%c0_4, %c0_5] : memref<1x128xf32, #tpu.memory_space<vmem>>, vector<1x128xf32>
    %7 = vector.shape_cast %6 : vector<1x128xf32> to vector<1x1x128xf32>
    %8 = vector.broadcast %7 : vector<1x1x128xf32> to vector<2x16x128xf32>
    %9 = arith.addf %5, %8 : vector<2x16x128xf32>
    %cst = arith.constant 0.000000e+00 : f32
    %10 = vector.broadcast %cst : f32 to vector<2x16x128xf32>
    %11 = arith.cmpf ogt, %9, %10 : vector<2x16x128xf32>
    %12 = math.exp %9 : vector<2x16x128xf32>
    %cst_6 = arith.constant 1.000000e+00 : f32
    %13 = vector.broadcast %cst_6 : f32 to vector<2x16x128xf32>
    %14 = arith.subf %12, %13 : vector<2x16x128xf32>
    %15 = arith.select %11, %9, %14 : vector<2x16x128xi1>, vector<2x16x128xf32>
    %16 = vector.extract_strided_slice %15 {offsets = [0, 0, 0], sizes = [1, 16, 128], strides = [1, 1, 1]} : vector<2x16x128xf32> to vector<1x16x128xf32>
    %17 = vector.shape_cast %16 : vector<1x16x128xf32> to vector<16x128xf32>
    %c1_i32 = arith.constant 1 : i32
    %18 = tpu.dynamic_rotate %17 by %c1_i32 dim 0 : vector<16x128xf32>, i32 -> vector<16x128xf32>
    %c15_i32 = arith.constant 15 : i32
    %19 = tpu.dynamic_rotate %17 by %c15_i32 dim 0 : vector<16x128xf32>, i32 -> vector<16x128xf32>
    %20 = vector.extract_strided_slice %15 {offsets = [1, 0, 0], sizes = [1, 16, 128], strides = [1, 1, 1]} : vector<2x16x128xf32> to vector<1x16x128xf32>
    %21 = vector.shape_cast %20 : vector<1x16x128xf32> to vector<16x128xf32>
    %c1_i32_7 = arith.constant 1 : i32
    %22 = tpu.dynamic_rotate %21 by %c1_i32_7 dim 0 : vector<16x128xf32>, i32 -> vector<16x128xf32>
    %c15_i32_8 = arith.constant 15 : i32
    %23 = tpu.dynamic_rotate %21 by %c15_i32_8 dim 0 : vector<16x128xf32>, i32 -> vector<16x128xf32>
    %24 = tpu.concatenate %18, %22 in 0 : vector<16x128xf32>, vector<16x128xf32> -> vector<32x128xf32>
    %25 = tpu.concatenate %19, %23 in 0 : vector<16x128xf32>, vector<16x128xf32> -> vector<32x128xf32>
    %26 = vector.shape_cast %15 : vector<2x16x128xf32> to vector<32x128xf32>
    %27 = tpu.iota {dimensions = array<i32: 1>} : vector<2x16x128xi32>
    %28 = vector.shape_cast %27 : vector<2x16x128xi32> to vector<32x128xi32>
    %c0_i32 = arith.constant 0 : i32
    %29 = vector.broadcast %c0_i32 : i32 to vector<32x128xi32>
    %30 = arith.cmpi eq, %28, %29 : vector<32x128xi32>
    %cst_9 = arith.constant 0xFF800000 : f32
    %31 = vector.broadcast %cst_9 : f32 to vector<32x128xf32>
    %32 = arith.select %30, %31, %24 : vector<32x128xi1>, vector<32x128xf32>
    %c15_i32_10 = arith.constant 15 : i32
    %33 = vector.broadcast %c15_i32_10 : i32 to vector<32x128xi32>
    %34 = arith.cmpi eq, %28, %33 : vector<32x128xi32>
    %cst_11 = arith.constant 0xFF800000 : f32
    %35 = vector.broadcast %cst_11 : f32 to vector<32x128xf32>
    %36 = arith.select %34, %35, %25 : vector<32x128xi1>, vector<32x128xf32>
    %37 = arith.maximumf %32, %26 : vector<32x128xf32>
    %38 = arith.maximumf %37, %36 : vector<32x128xf32>
    %39 = vector.shape_cast %38 : vector<32x128xf32> to vector<2x16x128xf32>
    %40 = arith.truncf %39 : vector<2x16x128xf32> to vector<2x16x128xbf16>
    %c0_12 = arith.constant 0 : index
    %c0_13 = arith.constant 0 : index
    %c0_14 = arith.constant 0 : index
    %41 = vector.load %arg4[%c0_12, %c0_13, %c0_14] : memref<2x16x128xbf16, #tpu.memory_space<vmem>>, vector<2x16x128xbf16>
    tpu.vector_store %arg4[%c0_12, %c0_13, %c0_14], %40 {strides = array<i32>} : memref<2x16x128xbf16, #tpu.memory_space<vmem>>, vector<2x16x128xbf16>,
    return
  }
  func.func @transform_0(%arg0: i32) -> (i32, i32, i32) {
    %c0_i32 = arith.constant 0 : i32
    %c0_i32_0 = arith.constant 0 : i32
    %c0_i32_1 = arith.constant 0 : i32
    return %arg0, %c0_i32, %c0_i32_0 : i32, i32, i32
  }
  func.func @transform_1(%arg0: i32) -> (i32, i32) {
    %c0_i32 = arith.constant 0 : i32
    %c0_i32_0 = arith.constant 0 : i32
    %c0_i32_1 = arith.constant 0 : i32
    return %c0_i32, %c0_i32_0 : i32, i32
  }
  func.func @transform_2(%arg0: i32) -> (i32, i32) {
    %c0_i32 = arith.constant 0 : i32
    %c0_i32_0 = arith.constant 0 : i32
    %c0_i32_1 = arith.constant 0 : i32
    return %c0_i32, %c0_i32_0 : i32, i32
  }
  func.func @transform_3(%arg0: i32) -> (i32, i32, i32) {
    %c0_i32 = arith.constant 0 : i32
    %c0_i32_0 = arith.constant 0 : i32
    %c0_i32_1 = arith.constant 0 : i32
    return %arg0, %c0_i32, %c0_i32_0 : i32, i32, i32
  }
}

module attributes {stable_mosaic.version = 11 : i64} {
  func.func @_fused_bn_elu_pool_conv_kernel(%arg0: i32, %arg1: i32, %arg2: memref<2x16x128xbf16, #tpu.memory_space<vmem>>, %arg3: memref<1x128xf32, #tpu.memory_space<vmem>>, %arg4: memref<1x128xf32, #tpu.memory_space<vmem>>, %arg5: memref<3x128x128xbf16, #tpu.memory_space<vmem>>, %arg6: memref<2x16x128xbf16, #tpu.memory_space<vmem>>, %arg7: memref<1x1x128xf32, #tpu.memory_space<vmem>>, %arg8: memref<1x1x128xf32, #tpu.memory_space<vmem>>) attributes {dimension_semantics = [#tpu.dimension_semantics<parallel>, #tpu.dimension_semantics<arbitrary>], iteration_bounds = array<i64: 1, 1>, scalar_prefetch = 0 : i64, scratch_operands = 0 : i64, tpu.core_type = #tpu.core_type<tc>, window_params = [{transform_indices = @transform_0, window_bounds = array<i64: 2, 16, 128>}, {pipeline_mode = #tpu.pipeline_mode<synchronous>, transform_indices = @transform_1, window_bounds = array<i64: 1, 128>}, {pipeline_mode = #tpu.pipeline_mode<synchronous>, transform_indices = @transform_2, window_bounds = array<i64: 1, 128>}, {pipeline_mode = #tpu.pipeline_mode<synchronous>, transform_indices = @transform_3, window_bounds = array<i64: 3, 128, 128>}, {transform_indices = @transform_4, window_bounds = array<i64: 2, 16, 128>}, {transform_indices = @transform_5, window_bounds = array<i64: 1, 1, 128>}, {transform_indices = @transform_6, window_bounds = array<i64: 1, 1, 128>}]} {
    %c0 = arith.constant 0 : index
    %c0_0 = arith.constant 0 : index
    %c0_1 = arith.constant 0 : index
    %0 = vector.load %arg2[%c0, %c0_0, %c0_1] : memref<2x16x128xbf16, #tpu.memory_space<vmem>>, vector<2x16x128xbf16>
    %1 = arith.extf %0 : vector<2x16x128xbf16> to vector<2x16x128xf32>
    %c0_2 = arith.constant 0 : index
    %c0_3 = arith.constant 0 : index
    %2 = vector.load %arg3[%c0_2, %c0_3] : memref<1x128xf32, #tpu.memory_space<vmem>>, vector<1x128xf32>
    %3 = vector.shape_cast %2 : vector<1x128xf32> to vector<1x1x128xf32>
    %4 = vector.broadcast %3 : vector<1x1x128xf32> to vector<2x16x128xf32>
    %5 = arith.mulf %1, %4 : vector<2x16x128xf32>
    %c0_4 = arith.constant 0 : index
    %c0_5 = arith.constant 0 : index
    %6 = vector.load %arg4[%c0_4, %c0_5] : memref<1x128xf32, #tpu.memory_space<vmem>>, vector<1x128xf32>
    %7 = vector.shape_cast %6 : vector<1x128xf32> to vector<1x1x128xf32>
    %8 = vector.broadcast %7 : vector<1x1x128xf32> to vector<2x16x128xf32>
    %9 = arith.addf %5, %8 : vector<2x16x128xf32>
    %cst = arith.constant 0.000000e+00 : f32
    %10 = vector.broadcast %cst : f32 to vector<2x16x128xf32>
    %11 = arith.cmpf ogt, %9, %10 : vector<2x16x128xf32>
    %12 = math.exp %9 : vector<2x16x128xf32>
    %cst_6 = arith.constant 1.000000e+00 : f32
    %13 = vector.broadcast %cst_6 : f32 to vector<2x16x128xf32>
    %14 = arith.subf %12, %13 : vector<2x16x128xf32>
    %15 = arith.select %11, %9, %14 : vector<2x16x128xi1>, vector<2x16x128xf32>
    %16 = vector.extract_strided_slice %15 {offsets = [0, 0, 0], sizes = [1, 16, 128], strides = [1, 1, 1]} : vector<2x16x128xf32> to vector<1x16x128xf32>
    %17 = vector.shape_cast %16 : vector<1x16x128xf32> to vector<16x128xf32>
    %c1_i32 = arith.constant 1 : i32
    %18 = tpu.dynamic_rotate %17 by %c1_i32 dim 0 : vector<16x128xf32>, i32 -> vector<16x128xf32>
    %c15_i32 = arith.constant 15 : i32
    %19 = tpu.dynamic_rotate %17 by %c15_i32 dim 0 : vector<16x128xf32>, i32 -> vector<16x128xf32>
    %20 = vector.extract_strided_slice %15 {offsets = [1, 0, 0], sizes = [1, 16, 128], strides = [1, 1, 1]} : vector<2x16x128xf32> to vector<1x16x128xf32>
    %21 = vector.shape_cast %20 : vector<1x16x128xf32> to vector<16x128xf32>
    %c1_i32_7 = arith.constant 1 : i32
    %22 = tpu.dynamic_rotate %21 by %c1_i32_7 dim 0 : vector<16x128xf32>, i32 -> vector<16x128xf32>
    %c15_i32_8 = arith.constant 15 : i32
    %23 = tpu.dynamic_rotate %21 by %c15_i32_8 dim 0 : vector<16x128xf32>, i32 -> vector<16x128xf32>
    %24 = tpu.concatenate %18, %22 in 0 : vector<16x128xf32>, vector<16x128xf32> -> vector<32x128xf32>
    %25 = tpu.concatenate %19, %23 in 0 : vector<16x128xf32>, vector<16x128xf32> -> vector<32x128xf32>
    %26 = vector.shape_cast %15 : vector<2x16x128xf32> to vector<32x128xf32>
    %27 = tpu.iota {dimensions = array<i32: 1>} : vector<2x16x128xi32>
    %28 = vector.shape_cast %27 : vector<2x16x128xi32> to vector<32x128xi32>
    %c0_i32 = arith.constant 0 : i32
    %29 = vector.broadcast %c0_i32 : i32 to vector<32x128xi32>
    %30 = arith.cmpi eq, %28, %29 : vector<32x128xi32>
    %cst_9 = arith.constant 0xFF800000 : f32
    %31 = vector.broadcast %cst_9 : f32 to vector<32x128xf32>
    %32 = arith.select %30, %31, %24 : vector<32x128xi1>, vector<32x128xf32>
    %c15_i32_10 = arith.constant 15 : i32
    %33 = vector.broadcast %c15_i32_10 : i32 to vector<32x128xi32>
    %34 = arith.cmpi eq, %28, %33 : vector<32x128xi32>
    %cst_11 = arith.constant 0xFF800000 : f32
    %35 = vector.broadcast %cst_11 : f32 to vector<32x128xf32>
    %36 = arith.select %34, %35, %25 : vector<32x128xi1>, vector<32x128xf32>
    %37 = arith.maximumf %32, %26 : vector<32x128xf32>
    %38 = arith.maximumf %37, %36 : vector<32x128xf32>
    %39 = vector.shape_cast %38 : vector<32x128xf32> to vector<2x16x128xf32>
    %40 = vector.extract_strided_slice %39 {offsets = [0, 0, 0], sizes = [1, 16, 128], strides = [1, 1, 1]} : vector<2x16x128xf32> to vector<1x16x128xf32>
    %41 = vector.shape_cast %40 : vector<1x16x128xf32> to vector<16x128xf32>
    %c1_i32_12 = arith.constant 1 : i32
    %42 = tpu.dynamic_rotate %41 by %c1_i32_12 dim 0 : vector<16x128xf32>, i32 -> vector<16x128xf32>
    %c15_i32_13 = arith.constant 15 : i32
    %43 = tpu.dynamic_rotate %41 by %c15_i32_13 dim 0 : vector<16x128xf32>, i32 -> vector<16x128xf32>
    %44 = vector.extract_strided_slice %39 {offsets = [1, 0, 0], sizes = [1, 16, 128], strides = [1, 1, 1]} : vector<2x16x128xf32> to vector<1x16x128xf32>
    %45 = vector.shape_cast %44 : vector<1x16x128xf32> to vector<16x128xf32>
    %c1_i32_14 = arith.constant 1 : i32
    %46 = tpu.dynamic_rotate %45 by %c1_i32_14 dim 0 : vector<16x128xf32>, i32 -> vector<16x128xf32>
    %c15_i32_15 = arith.constant 15 : i32
    %47 = tpu.dynamic_rotate %45 by %c15_i32_15 dim 0 : vector<16x128xf32>, i32 -> vector<16x128xf32>
    %48 = tpu.concatenate %42, %46 in 0 : vector<16x128xf32>, vector<16x128xf32> -> vector<32x128xf32>
    %49 = tpu.concatenate %43, %47 in 0 : vector<16x128xf32>, vector<16x128xf32> -> vector<32x128xf32>
    %50 = vector.shape_cast %39 : vector<2x16x128xf32> to vector<32x128xf32>
    %51 = arith.truncf %48 : vector<32x128xf32> to vector<32x128xbf16>
    %c0_16 = arith.constant 0 : index
    %c0_17 = arith.constant 0 : index
    %c0_18 = arith.constant 0 : index
    %52 = vector.load %arg5[%c0_16, %c0_17, %c0_18] : memref<3x128x128xbf16, #tpu.memory_space<vmem>>, vector<1x128x128xbf16>
    %53 = vector.shape_cast %52 : vector<1x128x128xbf16> to vector<128x128xbf16>
    %cst_19 = arith.constant dense<0.000000e+00> : vector<32x128xf32>
    %54 = tpu.matmul %51, %53, %cst_19 {dimension_numbers = #tpu.dot_dimension_numbers<[1], [0], [0], [1], [0, 0, 1, 1], [], []>} : vector<32x128xbf16>, vector<128x128xbf16>, vector<32x128xf32> -> vector<32x128xf32>
    %55 = arith.truncf %50 : vector<32x128xf32> to vector<32x128xbf16>
    %c1 = arith.constant 1 : index
    %c0_20 = arith.constant 0 : index
    %c0_21 = arith.constant 0 : index
    %56 = vector.load %arg5[%c1, %c0_20, %c0_21] : memref<3x128x128xbf16, #tpu.memory_space<vmem>>, vector<1x128x128xbf16>
    %57 = vector.shape_cast %56 : vector<1x128x128xbf16> to vector<128x128xbf16>
    %cst_22 = arith.constant dense<0.000000e+00> : vector<32x128xf32>
    %58 = tpu.matmul %55, %57, %cst_22 {dimension_numbers = #tpu.dot_dimension_numbers<[1], [0], [0], [1], [0, 0, 1, 1], [], []>} : vector<32x128xbf16>, vector<128x128xbf16>, vector<32x128xf32> -> vector<32x128xf32>
    %59 = arith.addf %54, %58 : vector<32x128xf32>
    %60 = arith.truncf %49 : vector<32x128xf32> to vector<32x128xbf16>
    %c2 = arith.constant 2 : index
    %c0_23 = arith.constant 0 : index
    %c0_24 = arith.constant 0 : index
    %61 = vector.load %arg5[%c2, %c0_23, %c0_24] : memref<3x128x128xbf16, #tpu.memory_space<vmem>>, vector<1x128x128xbf16>
    %62 = vector.shape_cast %61 : vector<1x128x128xbf16> to vector<128x128xbf16>
    %cst_25 = arith.constant dense<0.000000e+00> : vector<32x128xf32>
    %63 = tpu.matmul %60, %62, %cst_25 {dimension_numbers = #tpu.dot_dimension_numbers<[1], [0], [0], [1], [0, 0, 1, 1], [], []>} : vector<32x128xbf16>, vector<128x128xbf16>, vector<32x128xf32> -> vector<32x128xf32>
    %64 = arith.addf %59, %63 : vector<32x128xf32>
    %65 = vector.shape_cast %64 : vector<32x128xf32> to vector<2x16x128xf32>
    %66 = arith.truncf %65 : vector<2x16x128xf32> to vector<2x16x128xbf16>
    %c0_26 = arith.constant 0 : index
    %c0_27 = arith.constant 0 : index
    %c0_28 = arith.constant 0 : index
    %67 = vector.load %arg6[%c0_26, %c0_27, %c0_28] : memref<2x16x128xbf16, #tpu.memory_space<vmem>>, vector<2x16x128xbf16>
    tpu.vector_store %arg6[%c0_26, %c0_27, %c0_28], %66 {strides = array<i32>} : memref<2x16x128xbf16, #tpu.memory_space<vmem>>, vector<2x16x128xbf16>,
    %c0_i32_29 = arith.constant 0 : i32
    %68 = arith.cmpi eq, %arg1, %c0_i32_29 : i32
    %69 = arith.extui %68 : i1 to i32
    %c0_i32_30 = arith.constant 0 : i32
    %70 = arith.cmpi ne, %69, %c0_i32_30 : i32
    scf.if %70 {
      %cst_45 = arith.constant 0.000000e+00 : f32
      %84 = vector.broadcast %cst_45 : f32 to vector<1x1x128xf32>
      %c0_46 = arith.constant 0 : index
      %c0_47 = arith.constant 0 : index
      %c0_48 = arith.constant 0 : index
      %85 = vector.load %arg7[%c0_46, %c0_47, %c0_48] : memref<1x1x128xf32, #tpu.memory_space<vmem>>, vector<1x1x128xf32>
      tpu.vector_store %arg7[%c0_46, %c0_47, %c0_48], %84 {strides = array<i32>} : memref<1x1x128xf32, #tpu.memory_space<vmem>>, vector<1x1x128xf32>,
      %cst_49 = arith.constant 0.000000e+00 : f32
      %86 = vector.broadcast %cst_49 : f32 to vector<1x1x128xf32>
      %c0_50 = arith.constant 0 : index
      %c0_51 = arith.constant 0 : index
      %c0_52 = arith.constant 0 : index
      %87 = vector.load %arg8[%c0_50, %c0_51, %c0_52] : memref<1x1x128xf32, #tpu.memory_space<vmem>>, vector<1x1x128xf32>
      tpu.vector_store %arg8[%c0_50, %c0_51, %c0_52], %86 {strides = array<i32>} : memref<1x1x128xf32, #tpu.memory_space<vmem>>, vector<1x1x128xf32>,
    } else {
    }
    %c0_31 = arith.constant 0 : index
    %c0_32 = arith.constant 0 : index
    %c0_33 = arith.constant 0 : index
    %71 = vector.load %arg7[%c0_31, %c0_32, %c0_33] : memref<1x1x128xf32, #tpu.memory_space<vmem>>, vector<1x1x128xf32>
    %cst_34 = arith.constant dense<0.000000e+00> : vector<128xf32>
    %72 = vector.multi_reduction <add>, %64, %cst_34 [0] : vector<32x128xf32> to vector<128xf32>
    %73 = vector.shape_cast %72 : vector<128xf32> to vector<1x128xf32>
    %74 = vector.shape_cast %73 : vector<1x128xf32> to vector<1x1x128xf32>
    %75 = arith.addf %71, %74 : vector<1x1x128xf32>
    %c0_35 = arith.constant 0 : index
    %c0_36 = arith.constant 0 : index
    %c0_37 = arith.constant 0 : index
    %76 = vector.load %arg7[%c0_35, %c0_36, %c0_37] : memref<1x1x128xf32, #tpu.memory_space<vmem>>, vector<1x1x128xf32>
    tpu.vector_store %arg7[%c0_35, %c0_36, %c0_37], %75 {strides = array<i32>} : memref<1x1x128xf32, #tpu.memory_space<vmem>>, vector<1x1x128xf32>,
    %c0_38 = arith.constant 0 : index
    %c0_39 = arith.constant 0 : index
    %c0_40 = arith.constant 0 : index
    %77 = vector.load %arg8[%c0_38, %c0_39, %c0_40] : memref<1x1x128xf32, #tpu.memory_space<vmem>>, vector<1x1x128xf32>
    %78 = arith.mulf %64, %64 : vector<32x128xf32>
    %cst_41 = arith.constant dense<0.000000e+00> : vector<128xf32>
    %79 = vector.multi_reduction <add>, %78, %cst_41 [0] : vector<32x128xf32> to vector<128xf32>
    %80 = vector.shape_cast %79 : vector<128xf32> to vector<1x128xf32>
    %81 = vector.shape_cast %80 : vector<1x128xf32> to vector<1x1x128xf32>
    %82 = arith.addf %77, %81 : vector<1x1x128xf32>
    %c0_42 = arith.constant 0 : index
    %c0_43 = arith.constant 0 : index
    %c0_44 = arith.constant 0 : index
    %83 = vector.load %arg8[%c0_42, %c0_43, %c0_44] : memref<1x1x128xf32, #tpu.memory_space<vmem>>, vector<1x1x128xf32>
    tpu.vector_store %arg8[%c0_42, %c0_43, %c0_44], %82 {strides = array<i32>} : memref<1x1x128xf32, #tpu.memory_space<vmem>>, vector<1x1x128xf32>,
    return
  }
  func.func @transform_0(%arg0: i32, %arg1: i32) -> (i32, i32, i32) {
    %c1_i32 = arith.constant 1 : i32
    %0 = arith.muli %arg0, %c1_i32 : i32
    %1 = arith.addi %0, %arg1 : i32
    %c0_i32 = arith.constant 0 : i32
    %c0_i32_0 = arith.constant 0 : i32
    %c0_i32_1 = arith.constant 0 : i32
    return %1, %c0_i32, %c0_i32_0 : i32, i32, i32
  }
  func.func @transform_1(%arg0: i32, %arg1: i32) -> (i32, i32) {
    %c0_i32 = arith.constant 0 : i32
    %c0_i32_0 = arith.constant 0 : i32
    %c0_i32_1 = arith.constant 0 : i32
    return %c0_i32, %c0_i32_0 : i32, i32
  }
  func.func @transform_2(%arg0: i32, %arg1: i32) -> (i32, i32) {
    %c0_i32 = arith.constant 0 : i32
    %c0_i32_0 = arith.constant 0 : i32
    %c0_i32_1 = arith.constant 0 : i32
    return %c0_i32, %c0_i32_0 : i32, i32
  }
  func.func @transform_3(%arg0: i32, %arg1: i32) -> (i32, i32, i32) {
    %c0_i32 = arith.constant 0 : i32
    %c0_i32_0 = arith.constant 0 : i32
    %c0_i32_1 = arith.constant 0 : i32
    %c0_i32_2 = arith.constant 0 : i32
    return %c0_i32, %c0_i32_0, %c0_i32_1 : i32, i32, i32
  }
  func.func @transform_4(%arg0: i32, %arg1: i32) -> (i32, i32, i32) {
    %c1_i32 = arith.constant 1 : i32
    %0 = arith.muli %arg0, %c1_i32 : i32
    %1 = arith.addi %0, %arg1 : i32
    %c0_i32 = arith.constant 0 : i32
    %c0_i32_0 = arith.constant 0 : i32
    %c0_i32_1 = arith.constant 0 : i32
    return %1, %c0_i32, %c0_i32_0 : i32, i32, i32
  }
  func.func @transform_5(%arg0: i32, %arg1: i32) -> (i32, i32, i32) {
    %c0_i32 = arith.constant 0 : i32
    %c0_i32_0 = arith.constant 0 : i32
    %c0_i32_1 = arith.constant 0 : i32
    return %arg0, %c0_i32, %c0_i32_0 : i32, i32, i32
  }
  func.func @transform_6(%arg0: i32, %arg1: i32) -> (i32, i32, i32) {
    %c0_i32 = arith.constant 0 : i32
    %c0_i32_0 = arith.constant 0 : i32
    %c0_i32_1 = arith.constant 0 : i32
    return %arg0, %c0_i32, %c0_i32_0 : i32, i32, i32
  }
}

</mosaic_0001>

<bundles_post_ra>
// kernel: conv_layer_forward.5
= control target key start
LH: loop header
LB: loop body
LE: loop exit
PB: predicated region body
PF: predicated region fallthrough
CT: control target
= control target key end

     0   :  { %v66_v20 = vlaneseq  ;;  %s221_s0 = inlined_call_operand.vmem [shape: bf16[2,16,128], index: 0, kind: input, shape index: {}, may-alias: {0,3}]   ;;  %s222_s1 = inlined_call_operand.vmem [shape: f32[1,128], index: 1, kind: input, shape index: {}]   ;;  %s223_s2 = inlined_call_operand.vmem [shape: f32[1,128], index: 2, kind: input, shape index: {}]   ;;  %s224_s3 = inlined_call_operand.vmem [shape: bf16[2,16,128], index: 3, kind: output, shape index: {}, may-alias: {0,3}]  }
   0x1   :  { %v144_v0 = vld [vmem:[%s221_s0] sm:$0xff]   ;;  %v161_v4 = vld [vmem:[%s221_s0 + $0x8] sm:$0xff]  }
   0x2   :  { %v129_v1 = vld [vmem:[%s222_s1] ss:$0 sm:$0xff]  ;;  %v145_v2 = vunpack.c.l.bf16 %v144_v0  ;;  %v146_v3 = vunpack.c.h.bf16 %v144_v0  ;;  %v149_v6 = vunpack.c.l.bf16 %v161_v4  ;;  %v150_v7 = vunpack.c.h.bf16 %v161_v4 }
   0x3   :  { %v130_v5 = vld [vmem:[%s223_s2] ss:$0 sm:$0xff]  ;;  %v67_v21 = vshrl.u32 %v66_v20, 7 }
   0x4   :  { %v29_v8 = vmul.f32 %v145_v2, %v129_v1  ;;  %v30_v9 = vmul.f32 %v146_v3, %v129_v1  ;;  %v31_v10 = vmul.f32 %v149_v6, %v129_v1  ;;  %v32_v11 = vmul.f32 %v150_v7, %v129_v1 }
   0x5   :  { %v84_v25 = vadd.s32 8, %v67_v21  ;;  %vm68_vm2 = vcmp.lt.s32.totalorder %v67_v21, 1  ;;  %vm73_vm3 = vcmp.lt.s32.totalorder %v67_v21, 7  ;;  %vm85_vm5 = vcmp.eq.s32.totalorder %v67_v21, 0 }
   0x6   :  { %v40_v12 = vadd.f32 %v130_v5, %v29_v8  ;;  %v41_v13 = vadd.f32 %v130_v5, %v30_v9  ;;  %v42_v14 = vadd.f32 %v130_v5, %v31_v10  ;;  %v43_v15 = vadd.f32 %v130_v5, %v32_v11 }
   0x7   :  { %vm92_vm7 = vcmp.eq.s32.totalorder %v84_v25, 15 }
   0x8   :  { %v48_v16 = vmul.f32 1.442695, %v40_v12  ;;  %v50_v17 = vmul.f32 1.442695, %v41_v13  ;;  %v52_v18 = vmul.f32 1.442695, %v42_v14 }
   0x9   :  { %v54_v19 = vmul.f32 1.442695, %v43_v15  ;;  %vm44_vm0 = vcmp.gt.f32.partialorder %v40_v12, 0.0  ;;  %vm45_vm1 = vcmp.gt.f32.partialorder %v41_v13, 0.0  ;;  %vm46_vm4 = vcmp.gt.f32.partialorder %v42_v14, 0.0 }
   0xa   :  { %163 = vpow2.f32 %v48_v16  ;;  %vm47_vm6 = vcmp.gt.f32.partialorder %v43_v15, 0.0 }
   0xb   :  { %165 = vpow2.f32 %v50_v17 }
   0xc   :  { %167 = vpow2.f32 %v52_v18 }
   0xd   :  { %169 = vpow2.f32 %v54_v19 }
  0x14   :  { %v164_v22 = vpop.eup %163 }
  0x15   :  { %v166_v23 = vpop.eup %165  ;;  %v131_v24 = vadd.f32 -1.0, %v164_v22 }
  0x16   :  { %v168_v26 = vpop.eup %167  ;;  %v132_v27 = vadd.f32 -1.0, %v166_v23 }
  0x17   :  { %v170_v28 = vpop.eup %169  ;;  %v60_v29 = vsel %vm44_vm0, %v40_v12, %v131_v24  ;;  %v133_v30 = vadd.f32 -1.0, %v168_v26 }
  0x18   :  { %v61_v31 = vsel %vm45_vm1, %v41_v13, %v132_v27  ;;  %v64_v32 = vrot.slane %v60_v29, 7  ;;  %v71_v33 = vrot.slane %v60_v29, 1  ;;  %v134_v34 = vadd.f32 -1.0, %v170_v28 }
  0x19   :  { %v65_v35 = vrot.slane %v61_v31, 7  ;;  %v72_v36 = vrot.slane %v61_v31, 1  ;;  %v62_v37 = vsel %vm46_vm4, %v42_v14, %v133_v30 }
  0x1a   :  { %v63_v38 = vsel %vm47_vm6, %v43_v15, %v134_v34  ;;  %v76_v39 = vrot.slane %v62_v37, 7  ;;  %v80_v40 = vrot.slane %v62_v37, 1 }
  0x1b   :  { %v69_v41 = vsel %vm68_vm2, %v64_v32, %v65_v35  ;;  %v70_v42 = vsel %vm68_vm2, %v65_v35, %v64_v32  ;;  %v74_v43 = vsel %vm73_vm3, %v71_v33, %v72_v36  ;;  %v75_v44 = vsel %vm73_vm3, %v72_v36, %v71_v33 }
  0x1c   :  { %v87_v45 = vsel %vm85_vm5, -inf, %v70_v42  ;;  %v94_v46 = vsel %vm92_vm7, -inf, %v75_v44  ;;  %v98_v47 = vmax.f32 %v69_v41, %v61_v31  ;;  %v77_v48 = vrot.slane %v63_v38, 7 }
  0x1d   :  { %v97_v49 = vmax.f32 %v87_v45, %v60_v29  ;;  %v81_v50 = vrot.slane %v63_v38, 1 }
  0x1e   :  { %v102_v51 = vmax.f32 %v98_v47, %v94_v46  ;;  %v78_v52 = vsel %vm68_vm2, %v76_v39, %v77_v48  ;;  %v79_v53 = vsel %vm68_vm2, %v77_v48, %v76_v39 }
  0x1f   :  { %v101_v54 = vmax.f32 %v97_v49, %v74_v43  ;;  %v82_v55 = vsel %vm73_vm3, %v80_v40, %v81_v50  ;;  %v83_v56 = vsel %vm73_vm3, %v81_v50, %v80_v40  ;;  %v89_v57 = vsel %vm85_vm5, -inf, %v79_v53 }
  0x20   :  { %v96_v58 = vsel %vm92_vm7, -inf, %v83_v56  ;;  %v99_v59 = vmax.f32 %v89_v57, %v62_v37  ;;  %v100_v60 = vmax.f32 %v78_v52, %v63_v38 }
  0x21   :  { %v154_v61 = vpack.c.bf16 %v102_v51, %v101_v54 }
  0x22   :  { %v103_v62 = vmax.f32 %v99_v59, %v82_v55  ;;  %v104_v63 = vmax.f32 %v100_v60, %v96_v58 }
  0x23   :  { %155 = vst [vmem:[%s224_s3] sm:$0xff] %v154_v61  }
  0x24   :  { %v159_v0 = vpack.c.bf16 %v104_v63, %v103_v62 }
  0x26   :  { %162 = vst [vmem:[%s224_s3 + $0x8] sm:$0xff] %v159_v0  }

// kernel: conv_layer_forward.4
= control target key start
LH: loop header
LB: loop body
LE: loop exit
PB: predicated region body
PF: predicated region fallthrough
CT: control target
= control target key end

     0   :  { %v114_v32 = vlaneseq  ;;  %s1042_s3 = inlined_call_operand.vmem [shape: bf16[3,128,128], index: 3, kind: input, shape index: {}]   ;;  %s1043_s0 = inlined_call_operand.vmem [shape: bf16[2,16,128], index: 0, kind: input, shape index: {}, may-alias: {0,4}]   ;;  %s1044_s1 = inlined_call_operand.vmem [shape: f32[1,128], index: 1, kind: input, shape index: {}]   ;;  %s1045_s2 = inlined_call_operand.vmem [shape: f32[1,128], index: 2, kind: input, shape index: {}]   ;;  %s1046_s5 = inlined_call_operand.vmem [shape: f32[1,1,128], index: 5, kind: output, shape index: {1}]   ;;  %s1047_s6 = inlined_call_operand.vmem [shape: f32[1,1,128], index: 6, kind: output, shape index: {2}]   ;;  %s1048_s4 = inlined_call_operand.vmem [shape: bf16[2,16,128], index: 4, kind: output, shape index: {0}, may-alias: {0,4}]  }
   0x1   :  { %v805_v0 = vld [vmem:[%s1042_s3] sm:$0xff]   ;;  %v806_v1 = vld [vmem:[%s1042_s3 + $0x8] sm:$0xff]   ;;  %v807_v2 = vld [vmem:[%s1042_s3 + $0x10] sm:$0xff]  }
   0x2   :  { %756 = vmatprep.subr.bf16.mxu0 %v805_v0  ;;  %v808_v3 = vld [vmem:[%s1042_s3 + $0x18] sm:$0xff]   ;;  %v813_v4 = vld [vmem:[%s1042_s3 + $0x40] sm:$0xff]   ;;  %v704_v6 = vld [vmem:[%s1043_s0 + $0x8] sm:$0xff]   ;;  %v933_v35 = vshrl.u32 %v114_v32, 7 }
   0x3   :  { %757 = vmatpush3.bf16.msra.mxu0 %v805_v0  ;;  %v687_v5 = vld [vmem:[%s1043_s0] sm:$0xff]   ;;  %736 = vmatprep.subr.bf16.mxu1 %v813_v4  ;;  %v692_v11 = vunpack.c.l.bf16 %v704_v6  ;;  %v693_v12 = vunpack.c.h.bf16 %v704_v6  ;;  %v815_v18 = vld [vmem:[%s1042_s3 + $0x48] sm:$0xff]   ;;  %v817_v23 = vld [vmem:[%s1042_s3 + $0x50] sm:$0xff]  }
   0x4   :  { %758 = vmatprep.subr.bf16.mxu0 %v806_v1  ;;  %v616_v7 = vld [vmem:[%s1044_s1] ss:$0 sm:$0xff]  ;;  %v688_v9 = vunpack.c.l.bf16 %v687_v5  ;;  %v689_v10 = vunpack.c.h.bf16 %v687_v5  ;;  %737 = vmatpush3.bf16.msra.mxu1 %v813_v4  ;;  %v810_v24 = vld [vmem:[%s1042_s3 + $0x28] sm:$0xff]   ;;  %v819_v25 = vld [vmem:[%s1042_s3 + $0x58] sm:$0xff]   ;;  %v132_v41 = vadd.s32 8, %v933_v35  ;;  %vm116_vm3 = vcmp.lt.s32.totalorder %v933_v35, 1 }
   0x5   :  { %v809_v8 = vld [vmem:[%s1042_s3 + $0x20] sm:$0xff]   ;;  %v79_v16 = vmul.f32 %v692_v11, %v616_v7  ;;  %v80_v17 = vmul.f32 %v693_v12, %v616_v7  ;;  %738 = vmatprep.subr.bf16.mxu1 %v815_v18  ;;  %v811_v30 = vld [vmem:[%s1042_s3 + $0x30] sm:$0xff]   ;;  %v812_v33 = vld [vmem:[%s1042_s3 + $0x38] sm:$0xff]   ;;  %vm121_vm4 = vcmp.lt.s32.totalorder %v933_v35, 7  ;;  %vm133_vm6 = vcmp.eq.s32.totalorder %v933_v35, 0 }
   0x6   :  { %v617_v13 = vld [vmem:[%s1045_s2] ss:$0 sm:$0xff]  ;;  %v77_v14 = vmul.f32 %v688_v9, %v616_v7  ;;  %v78_v15 = vmul.f32 %v689_v10, %v616_v7  ;;  %v823_v34 = vld [vmem:[%s1042_s3 + $0x68] sm:$0xff]   ;;  %v825_v37 = vld [vmem:[%s1042_s3 + $0x70] sm:$0xff]   ;;  %vm140_vm7 = vcmp.eq.s32.totalorder %v132_v41, 15 }
   0x7   :  { %759 = vmatpush3.bf16.msra.mxu0 %v806_v1  ;;  %v906_v21 = vadd.f32 %v617_v13, %v79_v16  ;;  %v908_v22 = vadd.f32 %v617_v13, %v80_v17  ;;  %v821_v31 = vld [vmem:[%s1042_s3 + $0x60] sm:$0xff]   ;;  %v827_v47 = vld [vmem:[%s1042_s3 + $0x78] sm:$0xff]  }
   0x8   :  { %760 = vmatprep.subr.bf16.mxu0 %v807_v2  ;;  %v88_v19 = vadd.f32 %v617_v13, %v77_v14  ;;  %v89_v20 = vadd.f32 %v617_v13, %v78_v15  ;;  %739 = vmatpush3.bf16.msra.mxu1 %v815_v18  ;;  %v938_v36 = vld [vmem:[%s1042_s3 + $0x80] sm:$0xff]  }
   0x9   :  { %740 = vmatprep.subr.bf16.mxu1 %v817_v23  ;;  %v100_v28 = vmul.f32 1.442695, %v906_v21  ;;  %v102_v29 = vmul.f32 1.442695, %v908_v22  ;;  %vm94_vm2 = vcmp.gt.f32.partialorder %v906_v21, 0.0  ;;  %vm95_vm5 = vcmp.gt.f32.partialorder %v908_v22, 0.0 }
   0xa   :  { %v96_v26 = vmul.f32 1.442695, %v88_v19  ;;  %v98_v27 = vmul.f32 1.442695, %v89_v20  ;;  %vm92_vm0 = vcmp.gt.f32.partialorder %v88_v19, 0.0  ;;  %vm93_vm1 = vcmp.gt.f32.partialorder %v89_v20, 0.0 }
   0xb   :  { %761 = vmatpush3.bf16.msra.mxu0 %v807_v2 }
   0xc   :  { %762 = vmatprep.subr.bf16.mxu0 %v808_v3  ;;  %829 = vpow2.f32 %v96_v26  ;;  %741 = vmatpush3.bf16.msra.mxu1 %v817_v23 }
   0xd   :  { %831 = vpow2.f32 %v98_v27  ;;  %742 = vmatprep.subr.bf16.mxu1 %v819_v25 }
   0xe   :  { %833 = vpow2.f32 %v100_v28 }
   0xf   :  { %763 = vmatpush3.bf16.msra.mxu0 %v808_v3  ;;  %835 = vpow2.f32 %v102_v29 }
  0x10   :  { %764 = vmatprep.subr.bf16.mxu0 %v809_v8  ;;  %743 = vmatpush3.bf16.msra.mxu1 %v819_v25 }
  0x11   :  { %744 = vmatprep.subr.bf16.mxu1 %v821_v31 }
  0x13   :  { %765 = vmatpush3.bf16.msra.mxu0 %v809_v8 }
  0x14   :  { %766 = vmatprep.subr.bf16.mxu0 %v810_v24  ;;  %745 = vmatpush3.bf16.msra.mxu1 %v821_v31 }
  0x15   :  { %746 = vmatprep.subr.bf16.mxu1 %v823_v34 }
  0x16   :  { %v830_v38 = vpop.eup %829 }
  0x17   :  { %767 = vmatpush3.bf16.msra.mxu0 %v810_v24  ;;  %v832_v39 = vpop.eup %831  ;;  %v618_v40 = vadd.f32 -1.0, %v830_v38  ;;  %v822_v38 = vld [vmem:[%s1042_s3 + $0xa0] sm:$0xff]  }
  0x18   :  { %768 = vmatprep.subr.bf16.mxu0 %v811_v30  ;;  %v834_v42 = vpop.eup %833  ;;  %v619_v43 = vadd.f32 -1.0, %v832_v39  ;;  %747 = vmatpush3.bf16.msra.mxu1 %v823_v34  ;;  %v818_v34 = vld [vmem:[%s1042_s3 + $0x90] sm:$0xff]  }
  0x19   :  { %v836_v44 = vpop.eup %835  ;;  %v620_v45 = vadd.f32 -1.0, %v834_v42  ;;  %v108_v46 = vsel %vm92_vm0, %v88_v19, %v618_v40  ;;  %748 = vmatprep.subr.bf16.mxu1 %v825_v37  ;;  %v826_v39 = vld [vmem:[%s1042_s3 + $0xb0] sm:$0xff]   ;;  %v828_v42 = vld [vmem:[%s1042_s3 + $0xb8] sm:$0xff]  }
  0x1a   :  { %v621_v48 = vadd.f32 -1.0, %v836_v44  ;;  %v109_v49 = vsel %vm93_vm1, %v89_v20, %v619_v43  ;;  %v112_v50 = vrot.slane %v108_v46, 7  ;;  %v119_v51 = vrot.slane %v108_v46, 1 }
  0x1b   :  { %769 = vmatpush3.bf16.msra.mxu0 %v811_v30  ;;  %v110_v52 = vsel %vm94_vm2, %v906_v21, %v620_v45  ;;  %v113_v53 = vrot.slane %v109_v49, 7  ;;  %v120_v54 = vrot.slane %v109_v49, 1 }
  0x1c   :  { %770 = vmatprep.subr.bf16.mxu0 %v812_v33  ;;  %v111_v55 = vsel %vm95_vm5, %v908_v22, %v621_v48  ;;  %v124_v56 = vrot.slane %v110_v52, 7  ;;  %v128_v57 = vrot.slane %v110_v52, 1  ;;  %749 = vmatpush3.bf16.msra.mxu1 %v825_v37  ;;  %v820_v37 = vld [vmem:[%s1042_s3 + $0x98] sm:$0xff]  }
  0x1d   :  { %v117_v58 = vsel %vm116_vm3, %v112_v50, %v113_v53  ;;  %v118_v59 = vsel %vm116_vm3, %v113_v53, %v112_v50  ;;  %v122_v60 = vsel %vm121_vm4, %v119_v51, %v120_v54  ;;  %v123_v61 = vsel %vm121_vm4, %v120_v54, %v119_v51  ;;  %750 = vmatprep.subr.bf16.mxu1 %v827_v47 }
  0x1e   :  { %v125_v62 = vrot.slane %v111_v55, 7  ;;  %v129_v63 = vrot.slane %v111_v55, 1  ;;  %v135_v0 = vsel %vm133_vm6, -inf, %v118_v59  ;;  %v142_v1 = vsel %vm140_vm7, -inf, %v123_v61 }
  0x1f   :  { %771 = vmatpush3.bf16.msra.mxu0 %v812_v33  ;;  %v145_v2 = vmax.f32 %v135_v0, %v108_v46  ;;  %v146_v3 = vmax.f32 %v117_v58, %v109_v49  ;;  %v816_v33 = vld [vmem:[%s1042_s3 + $0x88] sm:$0xff]   ;;  %v837_v46 = vmov 0.0  }
  0x20   :  { %776 = vmatprep.subr.bf16.mxu0 %v938_v36  ;;  %v127_v4 = vsel %vm116_vm3, %v125_v62, %v124_v56  ;;  %v131_v5 = vsel %vm121_vm4, %v129_v63, %v128_v57  ;;  %v126_v6 = vsel %vm116_vm3, %v124_v56, %v125_v62  ;;  %v130_v7 = vsel %vm121_vm4, %v128_v57, %v129_v63 }
  0x21   :  { %751 = vmatpush3.bf16.msra.mxu1 %v827_v47  ;;  %v137_v8 = vsel %vm133_vm6, -inf, %v127_v4  ;;  %v144_v9 = vsel %vm140_vm7, -inf, %v131_v5  ;;  %v149_v10 = vmax.f32 %v145_v2, %v122_v60  ;;  %v150_v11 = vmax.f32 %v146_v3, %v142_v1  ;;  %544 = vst [vmem:[%s1046_s5] sm:$0x1] %v837_v46  ;;  %545 = vst [vmem:[%s1047_s6] sm:$0x1] %v837_v46 }
  0x22   :  { %v147_v12 = vmax.f32 %v137_v8, %v110_v52  ;;  %v148_v13 = vmax.f32 %v126_v6, %v111_v55 }
  0x23   :  { %v153_v14 = vrot.slane %v149_v10, 7  ;;  %v154_v15 = vrot.slane %v150_v11, 7  ;;  %v187_v16 = vpack.c.bf16 %v150_v11, %v149_v10  ;;  %v157_v17 = vrot.slane %v149_v10, 1 }
  0x24   :  { %v151_v18 = vmax.f32 %v147_v12, %v130_v7  ;;  %v152_v19 = vmax.f32 %v148_v13, %v144_v9  ;;  %v158_v20 = vrot.slane %v150_v11, 1 }
  0x25   :  { %v155_v21 = vsel %vm116_vm3, %v153_v14, %v154_v15  ;;  %v156_v22 = vsel %vm116_vm3, %v154_v15, %v153_v14  ;;  %752 = vmatprep.mubr.bf16.mxu1 %v187_v16 }
  0x26   :  { %v169_v23 = vpack.c.bf16 %v155_v21, %v156_v22  ;;  %v161_v24 = vrot.slane %v151_v18, 7  ;;  %v162_v25 = vrot.slane %v152_v19, 7  ;;  %v188_v26 = vpack.c.bf16 %v152_v19, %v151_v18 }
  0x27   :  { %v159_v27 = vsel %vm121_vm4, %v157_v17, %v158_v20  ;;  %v160_v28 = vsel %vm121_vm4, %v158_v20, %v157_v17  ;;  %v165_v40 = vrot.slane %v151_v18, 1  ;;  %v166_v41 = vrot.slane %v152_v19, 1 }
  0x28   :  { %772 = vmatprep.mubr.bf16.mxu0 %v169_v23  ;;  %v163_v29 = vsel %vm116_vm3, %v161_v24, %v162_v25  ;;  %v164_v30 = vsel %vm116_vm3, %v162_v25, %v161_v24  ;;  %753 = vmatmul.mubr.bf16.vlgmr.msra.gmra.mrb[0].mxu1 %v188_v26  ;;  %v400_v31 = vpack.c.bf16 %v160_v28, %v159_v27  ;;  %v546_v15 = vld [vmem:[%s1046_s5] sm:$0x1] }
  0x29   :  { %v170_v32 = vpack.c.bf16 %v163_v29, %v164_v30  ;;  %v167_v43 = vsel %vm121_vm4, %v165_v40, %v166_v41  ;;  %v168_v44 = vsel %vm121_vm4, %v166_v41, %v165_v40  ;;  %v558_v18 = vld [vmem:[%s1047_s6] sm:$0x1] }
  0x2a   :  { %v401_v45 = vpack.c.bf16 %v168_v44, %v167_v43 }
  0x2b   :  { %773 = vmatmul.mubr.bf16.vlgmr.msra.gmra.mrb[0].mxu0 %v170_v32 }
  0x2c   :  { %777 = vmatpush3.bf16.msra.mxu0 %v938_v36  ;;  %792 = vmatprep.mubr.bf16.mxu0 %v400_v31  ;;  %v824_v36 = vld [vmem:[%s1042_s3 + $0xa8] sm:$0xff]  }
  0x2d   :  { %778 = vmatprep.subr.bf16.mxu0 %v816_v33 }
  0x30   :  { %779 = vmatpush3.bf16.msra.mxu0 %v816_v33 }
  0x31   :  { %780 = vmatprep.subr.bf16.mxu0 %v818_v34 }
  0x34   :  { %781 = vmatpush3.bf16.msra.mxu0 %v818_v34 }
  0x35   :  { %782 = vmatprep.subr.bf16.mxu0 %v820_v37 }
  0x38   :  { %783 = vmatpush3.bf16.msra.mxu0 %v820_v37 }
  0x39   :  { %784 = vmatprep.subr.bf16.mxu0 %v822_v38 }
  0x3c   :  { %785 = vmatpush3.bf16.msra.mxu0 %v822_v38 }
  0x3d   :  { %786 = vmatprep.subr.bf16.mxu0 %v824_v36 }
  0x40   :  { %787 = vmatpush3.bf16.msra.mxu0 %v824_v36 }
  0x41   :  { %788 = vmatprep.subr.bf16.mxu0 %v826_v39 }
  0x44   :  { %789 = vmatpush3.bf16.msra.mxu0 %v826_v39 }
  0x45   :  { %790 = vmatprep.subr.bf16.mxu0 %v828_v42 }
  0x48   :  { %791 = vmatpush3.bf16.msra.mxu0 %v828_v42 }
  0x4b   :  { %793 = vmatmul.mubr.bf16.vlgmr.msra.gmra.mrb[0].mxu0 %v401_v45 }
  0xfb   :  { %v754_v47 = vpop.f32.mrb[0].mxu1 }
  0xfc   :  { %v288_v48 = vpop.f32.mrb[1].mxu1 }
  0xfd   :  { %v755_v49 = vpop.f32.mrb[2].mxu1 }
  0xfe   :  { %v291_v50 = vpop.f32.mrb[3].mxu1 }
 0x11e   :  { %v794_v51 = vpop.f32.mrb[0].mxu0 }
 0x11f   :  { %v796_v35 = vadd.f32 %v794_v51, %v754_v47  ;;  %v501_v52 = vpop.f32.mrb[1].mxu0 }
 0x120   :  { %v797_v53 = vadd.f32 %v501_v52, %v288_v48  ;;  %v795_v54 = vpop.f32.mrb[2].mxu0 }
 0x121   :  { %v798_v55 = vadd.f32 %v795_v54, %v755_v49  ;;  %v504_v56 = vpop.f32.mrb[3].mxu0  ;;  %v561_v63 = vmul.f32 %v796_v35, %v796_v35 }
 0x122   :  { %v799_v57 = vadd.f32 %v504_v56, %v291_v50  ;;  %v559_v59 = vmul.f32 %v797_v53, %v797_v53 }
 0x123   :  { %v702_v58 = vpack.c.bf16 %v798_v55, %v796_v35  ;;  %v562_v2 = vmul.f32 %v798_v55, %v798_v55 }
 0x124   :  { %v697_v60 = vpack.c.bf16 %v799_v57, %v797_v53  ;;  %v547_v61 = vadd.f32 %v799_v57, %v797_v53  ;;  %v560_v62 = vmul.f32 %v799_v57, %v799_v57 }
 0x125   :  { %705 = vst [vmem:[%s1048_s4 + $0x8] sm:$0xff] %v702_v58  }
 0x126   :  { %698 = vst [vmem:[%s1048_s4] sm:$0xff] %v697_v60   ;;  %v548_v0 = vadd.f32 %v796_v35, %v547_v61  ;;  %v563_v1 = vadd.f32 %v560_v62, %v559_v59 }
 0x128   :  { %v549_v3 = vadd.f32 %v798_v55, %v548_v0  ;;  %v564_v4 = vadd.f32 %v563_v1, %v561_v63 }
 0x12a   :  { %v550_v5 = vrot.slane %v549_v3, 4  ;;  %v565_v6 = vadd.f32 %v564_v4, %v562_v2 }
 0x12c   :  { %v551_v7 = vadd.f32 %v550_v5, %v549_v3  ;;  %v566_v8 = vrot.slane %v565_v6, 4 }
 0x12e   :  { %v552_v9 = vrot.slane %v551_v7, 2  ;;  %v567_v10 = vadd.f32 %v566_v8, %v565_v6 }
 0x130   :  { %v553_v11 = vadd.f32 %v552_v9, %v551_v7  ;;  %v568_v12 = vrot.slane %v567_v10, 2 }
 0x132   :  { %v554_v13 = vrot.slane %v553_v11, 1  ;;  %v569_v14 = vadd.f32 %v568_v12, %v567_v10 }
 0x134   :  { %v555_v16 = vadd.f32 %v554_v13, %v553_v11  ;;  %v570_v17 = vrot.slane %v569_v14, 1 }
 0x136   :  { %v556_v19 = vadd.f32 %v555_v16, %v546_v15  ;;  %v571_v20 = vadd.f32 %v570_v17, %v569_v14 }
 0x138   :  { %557 = vst [vmem:[%s1046_s5] sm:$0x1] %v556_v19  ;;  %v572_v21 = vadd.f32 %v571_v20, %v558_v18 }
 0x13a   :  { %573 = vst [vmem:[%s1047_s6] sm:$0x1] %v572_v21 }

// kernel: conv_layer_forward.3
= control target key start
LH: loop header
LB: loop body
LE: loop exit
PB: predicated region body
PF: predicated region fallthrough
CT: control target
= control target key end

     0   :  { %v66_v2 = vlaneseq  ;;  %v735_v52 = vmov 0.0   ;;  %s888_s1 = inlined_call_operand.vmem [shape: bf16[3,128,128], index: 1, kind: input, shape index: {}]   ;;  %s889_s0 = inlined_call_operand.vmem [shape: bf16[2,16,128], index: 0, kind: input, shape index: {}]   ;;  %s890_s3 = inlined_call_operand.vmem [shape: f32[1,1,128], index: 3, kind: output, shape index: {1}]   ;;  %s891_s4 = inlined_call_operand.vmem [shape: f32[1,1,128], index: 4, kind: output, shape index: {2}]   ;;  %s892_s2 = inlined_call_operand.vmem [shape: bf16[2,16,128], index: 2, kind: output, shape index: {0}]  }
   0x1   :  { %v707_v0 = vld [vmem:[%s888_s1] sm:$0xff]   ;;  %v708_v1 = vld [vmem:[%s888_s1 + $0x8] sm:$0xff]   ;;  %v709_v3 = vld [vmem:[%s888_s1 + $0x10] sm:$0xff]   ;;  %459 = vst [vmem:[%s890_s3] sm:$0x1] %v735_v52 }
   0x2   :  { %658 = vmatprep.subr.bf16.mxu0 %v707_v0  ;;  %v710_v4 = vld [vmem:[%s888_s1 + $0x18] sm:$0xff]   ;;  %v773_v5 = vshrl.u32 %v66_v2, 7  ;;  %v715_v6 = vld [vmem:[%s888_s1 + $0x40] sm:$0xff]   ;;  %v717_v10 = vld [vmem:[%s888_s1 + $0x48] sm:$0xff]   ;;  %460 = vst [vmem:[%s891_s4] sm:$0x1] %v735_v52 }
   0x3   :  { %659 = vmatpush3.bf16.msra.mxu0 %v707_v0  ;;  %v56_v7 = vld [vmem:[%s889_s0] sm:$0xff]   ;;  %638 = vmatprep.subr.bf16.mxu1 %v715_v6  ;;  %v719_v14 = vld [vmem:[%s888_s1 + $0x50] sm:$0xff]   ;;  %v712_v15 = vld [vmem:[%s888_s1 + $0x28] sm:$0xff]  }
   0x4   :  { %660 = vmatprep.subr.bf16.mxu0 %v708_v1  ;;  %v60_v8 = vunpack.c.l.bf16 %v56_v7  ;;  %v61_v9 = vunpack.c.h.bf16 %v56_v7  ;;  %639 = vmatpush3.bf16.msra.mxu1 %v715_v6  ;;  %vm68_vm0 = vcmp.lt.s32.totalorder %v773_v5, 1  ;;  %v711_v11 = vld [vmem:[%s888_s1 + $0x20] sm:$0xff]   ;;  %v801_v18 = vld [vmem:[%s889_s0 + $0x8] sm:$0xff]   ;;  %v721_v20 = vld [vmem:[%s888_s1 + $0x58] sm:$0xff]   ;;  %vm73_vm1 = vcmp.lt.s32.totalorder %v773_v5, 7 }
   0x5   :  { %654 = vmatprep.mubr.bf16.mxu1 %v56_v7  ;;  %640 = vmatprep.subr.bf16.mxu1 %v717_v10  ;;  %v713_v21 = vld [vmem:[%s888_s1 + $0x30] sm:$0xff]   ;;  %v62_v22 = vunpack.c.l.bf16 %v801_v18  ;;  %v63_v23 = vunpack.c.h.bf16 %v801_v18  ;;  %v723_v24 = vld [vmem:[%s888_s1 + $0x60] sm:$0xff]   ;;  %v714_v27 = vld [vmem:[%s888_s1 + $0x38] sm:$0xff]  }
   0x6   :  { %v64_v12 = vrot.slane %v60_v8, 7  ;;  %v65_v13 = vrot.slane %v61_v9, 7  ;;  %v725_v28 = vld [vmem:[%s888_s1 + $0x68] sm:$0xff]   ;;  %v71_v29 = vrot.slane %v60_v8, 1  ;;  %v72_v30 = vrot.slane %v61_v9, 1  ;;  %v716_v33 = vld [vmem:[%s888_s1 + $0x80] sm:$0xff]  }
   0x7   :  { %661 = vmatpush3.bf16.msra.mxu0 %v708_v1  ;;  %v76_v25 = vrot.slane %v62_v22, 7  ;;  %v77_v26 = vrot.slane %v63_v23, 7  ;;  %v727_v34 = vld [vmem:[%s888_s1 + $0x70] sm:$0xff]   ;;  %v718_v38 = vld [vmem:[%s888_s1 + $0x88] sm:$0xff]   ;;  %v729_v39 = vld [vmem:[%s888_s1 + $0x78] sm:$0xff]   ;;  %v80_v46 = vrot.slane %v62_v22, 1 }
   0x8   :  { %662 = vmatprep.subr.bf16.mxu0 %v709_v3  ;;  %v69_v16 = vsel %vm68_vm0, %v64_v12, %v65_v13  ;;  %v70_v17 = vsel %vm68_vm0, %v65_v13, %v64_v12  ;;  %641 = vmatpush3.bf16.msra.mxu1 %v717_v10  ;;  %v74_v36 = vsel %vm73_vm1, %v71_v29, %v72_v30  ;;  %v720_v41 = vld [vmem:[%s888_s1 + $0x90] sm:$0xff]   ;;  %v722_v42 = vld [vmem:[%s888_s1 + $0x98] sm:$0xff]   ;;  %v724_v43 = vld [vmem:[%s888_s1 + $0xa0] sm:$0xff]   ;;  %v81_v47 = vrot.slane %v63_v23, 1 }
   0x9   :  { %v84_v19 = vpack.c.bf16 %v69_v16, %v70_v17  ;;  %642 = vmatprep.subr.bf16.mxu1 %v719_v14  ;;  %v78_v31 = vsel %vm68_vm0, %v76_v25, %v77_v26  ;;  %v79_v32 = vsel %vm68_vm0, %v77_v26, %v76_v25  ;;  %v75_v37 = vsel %vm73_vm1, %v72_v30, %v71_v29  ;;  %v726_v44 = vld [vmem:[%s888_s1 + $0xa8] sm:$0xff]   ;;  %v728_v45 = vld [vmem:[%s888_s1 + $0xb0] sm:$0xff]   ;;  %v731_v48 = vld [vmem:[%s888_s1 + $0xb8] sm:$0xff]  }
   0xa   :  { %v85_v35 = vpack.c.bf16 %v78_v31, %v79_v32  ;;  %v315_v40 = vpack.c.bf16 %v75_v37, %v74_v36  ;;  %v82_v49 = vsel %vm73_vm1, %v80_v46, %v81_v47  ;;  %v83_v50 = vsel %vm73_vm1, %v81_v47, %v80_v46  ;;  %v461_v22 = vld [vmem:[%s890_s3] sm:$0x1] }
   0xb   :  { %663 = vmatpush3.bf16.msra.mxu0 %v709_v3  ;;  %674 = vmatprep.mubr.bf16.mxu0 %v84_v19  ;;  %v316_v51 = vpack.c.bf16 %v83_v50, %v82_v49  ;;  %v473_v25 = vld [vmem:[%s891_s4] sm:$0x1] }
   0xc   :  { %664 = vmatprep.subr.bf16.mxu0 %v710_v4  ;;  %643 = vmatpush3.bf16.msra.mxu1 %v719_v14 }
   0xd   :  { %644 = vmatprep.subr.bf16.mxu1 %v721_v20 }
   0xf   :  { %665 = vmatpush3.bf16.msra.mxu0 %v710_v4 }
  0x10   :  { %666 = vmatprep.subr.bf16.mxu0 %v711_v11  ;;  %645 = vmatpush3.bf16.msra.mxu1 %v721_v20 }
  0x11   :  { %646 = vmatprep.subr.bf16.mxu1 %v723_v24 }
  0x13   :  { %667 = vmatpush3.bf16.msra.mxu0 %v711_v11 }
  0x14   :  { %668 = vmatprep.subr.bf16.mxu0 %v712_v15  ;;  %647 = vmatpush3.bf16.msra.mxu1 %v723_v24 }
  0x15   :  { %648 = vmatprep.subr.bf16.mxu1 %v725_v28 }
  0x17   :  { %669 = vmatpush3.bf16.msra.mxu0 %v712_v15 }
  0x18   :  { %670 = vmatprep.subr.bf16.mxu0 %v713_v21  ;;  %649 = vmatpush3.bf16.msra.mxu1 %v725_v28 }
  0x19   :  { %650 = vmatprep.subr.bf16.mxu1 %v727_v34 }
  0x1b   :  { %671 = vmatpush3.bf16.msra.mxu0 %v713_v21 }
  0x1c   :  { %672 = vmatprep.subr.bf16.mxu0 %v714_v27  ;;  %651 = vmatpush3.bf16.msra.mxu1 %v727_v34 }
  0x1d   :  { %652 = vmatprep.subr.bf16.mxu1 %v729_v39 }
  0x1f   :  { %673 = vmatpush3.bf16.msra.mxu0 %v714_v27 }
  0x20   :  { %678 = vmatprep.subr.bf16.mxu0 %v716_v33  ;;  %653 = vmatpush3.bf16.msra.mxu1 %v729_v39 }
  0x22   :  { %675 = vmatmul.mubr.bf16.vlgmr.msra.gmra.mrb[0].mxu0 %v85_v35 }
  0x23   :  { %679 = vmatpush3.bf16.msra.mxu0 %v716_v33  ;;  %694 = vmatprep.mubr.bf16.mxu0 %v315_v40 }
  0x24   :  { %680 = vmatprep.subr.bf16.mxu0 %v718_v38  ;;  %655 = vmatmul.mubr.bf16.vlgmr.msra.gmra.mrb[0].mxu1 %v801_v18 }
  0x27   :  { %681 = vmatpush3.bf16.msra.mxu0 %v718_v38 }
  0x28   :  { %682 = vmatprep.subr.bf16.mxu0 %v720_v41 }
  0x2b   :  { %683 = vmatpush3.bf16.msra.mxu0 %v720_v41 }
  0x2c   :  { %684 = vmatprep.subr.bf16.mxu0 %v722_v42 }
  0x2f   :  { %685 = vmatpush3.bf16.msra.mxu0 %v722_v42 }
  0x30   :  { %686 = vmatprep.subr.bf16.mxu0 %v724_v43 }
  0x33   :  { %687 = vmatpush3.bf16.msra.mxu0 %v724_v43 }
  0x34   :  { %688 = vmatprep.subr.bf16.mxu0 %v726_v44 }
  0x37   :  { %689 = vmatpush3.bf16.msra.mxu0 %v726_v44 }
  0x38   :  { %690 = vmatprep.subr.bf16.mxu0 %v728_v45 }
  0x3b   :  { %691 = vmatpush3.bf16.msra.mxu0 %v728_v45 }
  0x3c   :  { %692 = vmatprep.subr.bf16.mxu0 %v731_v48 }
  0x3f   :  { %693 = vmatpush3.bf16.msra.mxu0 %v731_v48 }
  0x42   :  { %695 = vmatmul.mubr.bf16.vlgmr.msra.gmra.mrb[0].mxu0 %v316_v51 }
  0xf7   :  { %v656_v53 = vpop.f32.mrb[0].mxu1 }
  0xf8   :  { %v203_v54 = vpop.f32.mrb[1].mxu1 }
  0xf9   :  { %v657_v55 = vpop.f32.mrb[2].mxu1 }
  0xfa   :  { %v206_v56 = vpop.f32.mrb[3].mxu1 }
 0x115   :  { %v696_v57 = vpop.f32.mrb[0].mxu0 }
 0x116   :  { %v698_v58 = vadd.f32 %v696_v57, %v656_v53  ;;  %v416_v59 = vpop.f32.mrb[1].mxu0 }
 0x117   :  { %v699_v60 = vadd.f32 %v416_v59, %v203_v54  ;;  %v697_v61 = vpop.f32.mrb[2].mxu0 }
 0x118   :  { %v700_v62 = vadd.f32 %v697_v61, %v657_v55  ;;  %v419_v63 = vpop.f32.mrb[3].mxu0  ;;  %v476_v6 = vmul.f32 %v698_v58, %v698_v58 }
 0x119   :  { %v701_v0 = vadd.f32 %v419_v63, %v206_v56  ;;  %v474_v2 = vmul.f32 %v699_v60, %v699_v60 }
 0x11a   :  { %v605_v1 = vpack.c.bf16 %v700_v62, %v698_v58  ;;  %v477_v9 = vmul.f32 %v700_v62, %v700_v62 }
 0x11b   :  { %v600_v3 = vpack.c.bf16 %v701_v0, %v699_v60  ;;  %v462_v4 = vadd.f32 %v701_v0, %v699_v60  ;;  %v475_v5 = vmul.f32 %v701_v0, %v701_v0 }
 0x11c   :  { %607 = vst [vmem:[%s892_s2 + $0x8] sm:$0xff] %v605_v1  }
 0x11d   :  { %601 = vst [vmem:[%s892_s2] sm:$0xff] %v600_v3   ;;  %v463_v7 = vadd.f32 %v698_v58, %v462_v4  ;;  %v478_v8 = vadd.f32 %v475_v5, %v474_v2 }
 0x11f   :  { %v464_v10 = vadd.f32 %v700_v62, %v463_v7  ;;  %v479_v11 = vadd.f32 %v478_v8, %v476_v6 }
 0x121   :  { %v465_v12 = vrot.slane %v464_v10, 4  ;;  %v480_v13 = vadd.f32 %v479_v11, %v477_v9 }
 0x123   :  { %v466_v14 = vadd.f32 %v465_v12, %v464_v10  ;;  %v481_v15 = vrot.slane %v480_v13, 4 }
 0x125   :  { %v467_v16 = vrot.slane %v466_v14, 2  ;;  %v482_v17 = vadd.f32 %v481_v15, %v480_v13 }
 0x127   :  { %v468_v18 = vadd.f32 %v467_v16, %v466_v14  ;;  %v483_v19 = vrot.slane %v482_v17, 2 }
 0x129   :  { %v469_v20 = vrot.slane %v468_v18, 1  ;;  %v484_v21 = vadd.f32 %v483_v19, %v482_v17 }
 0x12b   :  { %v470_v23 = vadd.f32 %v469_v20, %v468_v18  ;;  %v485_v24 = vrot.slane %v484_v21, 1 }
 0x12d   :  { %v471_v26 = vadd.f32 %v470_v23, %v461_v22  ;;  %v486_v27 = vadd.f32 %v485_v24, %v484_v21 }
 0x12f   :  { %472 = vst [vmem:[%s890_s3] sm:$0x1] %v471_v26  ;;  %v487_v28 = vadd.f32 %v486_v27, %v473_v25 }
 0x131   :  { %488 = vst [vmem:[%s891_s4] sm:$0x1] %v487_v28 }

</bundles_post_ra>
